<compile_context>
chip_gen: v5e
topology: v5e:2x2
jax: 0.10.0
libtpu: 0.0.40
codegen_flags: <defaults>
</compile_context>

<pallas_src>
import jax
import jax.numpy as jnp
from jax import lax
from jax.experimental import pallas as pl
from jax.experimental.pallas import tpu as pltpu


_ROW_CHUNK = 512  # rows per inner compute step; bounds live vregs independent of tb


def dqn_kernel(x_ref, w1_ref, b1_ref, w2_ref, b2_ref, w3_ref, b3_ref, out_ref):
    tb = x_ref.shape[0]
    chunk = min(_ROW_CHUNK, tb)
    n_chunks = tb // chunk  # tb is chosen so chunk divides tb

    # Resident params (constant index_map): tiny, loaded once per grid step.
    w1 = w1_ref[...]; b1 = b1_ref[...]
    w2 = w2_ref[...]; b2 = b2_ref[...]
    w3 = w3_ref[...]; b3 = b3_ref[...]

    def compute_chunk(r):
        # In-kernel bf16 cast of the streamed f32 rows; MXU matmuls accumulate
        # in f32; bias-add / ReLU stay f32 (no bf16 VPU on v5e).
        x = x_ref[pl.ds(r, chunk), :].astype(jnp.bfloat16)
        h1 = jnp.dot(x, w1, preferred_element_type=jnp.float32)
        h1 = jnp.maximum(h1 + b1, 0.0)
        h2 = jnp.dot(h1.astype(jnp.bfloat16), w2, preferred_element_type=jnp.float32)
        h2 = jnp.maximum(h2 + b2, 0.0)
        q = jnp.dot(h2.astype(jnp.bfloat16), w3, preferred_element_type=jnp.float32)
        out_ref[pl.ds(r, chunk), :] = (q + b3).astype(out_ref.dtype)

    if n_chunks == 1:
        compute_chunk(0)
    else:
        def body(c, carry):
            compute_chunk(pl.multiple_of(c * chunk, chunk))
            return carry
        lax.fori_loop(0, n_chunks, body, None, unroll=(n_chunks <= 8))


def _round_up(v, m):
    return ((v + m - 1) // m) * m


def _padded_tile_bytes(rows, cols, itemsize):
    # VMEM tiles are (sublane x 128 lane); sublane pack factor is dtype-aware:
    # 8 rows for f32, 16 for bf16, 32 for int8.
    sub = 8 * (4 // itemsize)
    return _round_up(max(rows, 1), sub) * _round_up(max(cols, 1), 128) * itemsize


def _vmem_ceiling_bytes():
    # Generation-aware ceiling: ~80% of physical VMEM (64 MiB v7x, 128 MiB
    # v5e/v6e), never above 100 MiB.
    try:
        cap = int(getattr(pltpu.get_tpu_info(), "vmem_capacity_bytes", 64 << 20))
    except Exception:  # pragma: no cover - conservative fallback
        cap = 64 << 20
    return min((cap * 4) // 5, 100 << 20)


def _vmem_estimate(tb, chunk, input_dim, fc1, fc2, n_actions):
    est = 0
    # Streamed, double-buffered tiles (lane-padded to 128).
    est += 2 * _padded_tile_bytes(tb, input_dim, 4)      # f32 x tiles
    est += 2 * _padded_tile_bytes(tb, n_actions, 4)      # f32 out tiles
    # Resident bf16 weights / f32 biases (assume 2 buffers each).
    est += 2 * (_padded_tile_bytes(input_dim, fc1, 2)
                + _padded_tile_bytes(fc1, fc2, 2)
                + _padded_tile_bytes(fc2, n_actions, 2)
                + _padded_tile_bytes(1, fc1, 4)
                + _padded_tile_bytes(1, fc2, 4)
                + _padded_tile_bytes(1, n_actions, 4))
    # Per-chunk intermediates (x bf16, h1/h2 f32 + bf16, q f32).
    est += _padded_tile_bytes(chunk, input_dim, 2)
    est += _padded_tile_bytes(chunk, fc1, 4) + _padded_tile_bytes(chunk, fc1, 2)
    est += _padded_tile_bytes(chunk, fc2, 4) + _padded_tile_bytes(chunk, fc2, 2)
    est += _padded_tile_bytes(chunk, n_actions, 4)
    return est


def _choose_tb(B, block_batch, input_dim, fc1, fc2, n_actions, ceiling):
    # Ensure >= 2 grid steps when B >= 16 so v7x's two TensorCores both work.
    target = pl.cdiv(B, 2) if B >= 16 else B
    tb = min(block_batch, _round_up(target, 8))
    if tb > _ROW_CHUNK:
        tb = _round_up(tb, _ROW_CHUNK)  # keep the inner row-chunk loop full-sized
    # Shrink the tile if (with 2x headroom) it would not fit this chip's VMEM.
    while tb > _ROW_CHUNK and 2 * _vmem_estimate(
            tb, min(_ROW_CHUNK, tb), input_dim, fc1, fc2, n_actions) > ceiling:
        tb = max(_ROW_CHUNK, ((tb // 2) // _ROW_CHUNK) * _ROW_CHUNK)
    return tb


def deep_q_network_forward(x, params, *, block_batch=4096):
    """x: (B, input_dim) float32. params: dict of w1,b1,w2,b2,w3,b3 (f32)."""
    w1, b1, w2, b2, w3, b3 = (params[k] for k in ("w1", "b1", "w2", "b2", "w3", "b3"))
    B, input_dim = x.shape
    fc1, fc2 = w1.shape[1], w2.shape[1]
    n_actions = w3.shape[1]

    # One-time bf16 cast of the (tiny) weights; x stays f32 and is cast in-kernel.
    w1_bf, w2_bf, w3_bf = (w.astype(jnp.bfloat16) for w in (w1, w2, w3))

    ceiling = _vmem_ceiling_bytes()
    tb = _choose_tb(B, block_batch, input_dim, fc1, fc2, n_actions, ceiling)
    chunk = min(_ROW_CHUNK, tb)
    grid = (pl.cdiv(B, tb),)  # ragged boundary handled by Pallas masking (no jnp.pad)

    vmem_limit = int(min(max(2 * _vmem_estimate(tb, chunk, input_dim, fc1, fc2,
                                                n_actions), 16 << 20), ceiling))

    # Constant index_map -> block index never changes -> params DMA'd once and
    # kept VMEM-resident across all batch tiles.
    resident = lambda a: pl.BlockSpec(a.shape, lambda i: (0,) * a.ndim)

    out = pl.pallas_call(
        dqn_kernel,
        out_shape=jax.ShapeDtypeStruct((B, n_actions), jnp.float32),
        grid=grid,
        in_specs=[
            pl.BlockSpec((tb, input_dim), lambda i: (i, 0)),   # x streams per batch tile
            resident(w1_bf), resident(b1),
            resident(w2_bf), resident(b2),
            resident(w3_bf), resident(b3),
        ],
        out_specs=pl.BlockSpec((tb, n_actions), lambda i: (i, 0)),
        compiler_params=pltpu.CompilerParams(
            dimension_semantics=("parallel",),  # shard batch tiles across v7x's 2 TCs
            vmem_limit_bytes=vmem_limit,
        ),
    )(x, w1_bf, b1, w2_bf, b2, w3_bf, b3)
    return out


def init_params(key, input_dim, fc1, fc2, n_actions):
    """Deterministic init mimicking nn.Linear's uniform(-1/sqrt(fan_in), 1/sqrt(fan_in))."""
    ks = jax.random.split(key, 6)

    def linear(kw, kb, fan_in, fan_out):
        bound = 1.0 / jnp.sqrt(fan_in)
        w = jax.random.uniform(kw, (fan_in, fan_out), jnp.float32, -bound, bound)
        b = jax.random.uniform(kb, (1, fan_out), jnp.float32, -bound, bound)
        return w, b

    w1, b1 = linear(ks[0], ks[1], input_dim, fc1)
    w2, b2 = linear(ks[2], ks[3], fc1, fc2)
    w3, b3 = linear(ks[4], ks[5], fc2, n_actions)
    return {"w1": w1, "b1": b1, "w2": w2, "b2": b2, "w3": w3, "b3": b3}


def reference_forward(x, p):
    h1 = jax.nn.relu(x @ p["w1"] + p["b1"])
    h2 = jax.nn.relu(h1 @ p["w2"] + p["b2"])
    return h2 @ p["w3"] + p["b3"]


if __name__ == "__main__":
    key = jax.random.PRNGKey(0)
    k_x, k_p, k_x2, k_x3 = jax.random.split(key, 4)

    # Module config: input_dims=(16,), fc1=32, fc2=32, n_actions=4; batch=8.
    B, input_dim, fc1, fc2, n_actions = 8, 16, 32, 32, 4

    x = jax.random.normal(k_x, (B, input_dim), dtype=jnp.float32)
    params = init_params(k_p, input_dim, fc1, fc2, n_actions)

    # NOTE: bf16 matmul operands introduce ~1e-2-level error vs the f32 PyTorch
    # reference; acceptable for DQN inference, hence the 2e-2 tolerance.
    q_vals = jax.block_until_ready(deep_q_network_forward(x, params))
    q_ref = reference_forward(x, params)
    assert q_vals.shape == (B, n_actions)
    assert jnp.allclose(q_vals, q_ref, atol=2e-2, rtol=2e-2), \
        float(jnp.max(jnp.abs(q_vals - q_ref)))

    # Multiple batch tiles + ragged (non-divisible) grid boundary, no jnp.pad copy.
    B2 = 300
    x2 = jax.random.normal(k_x2, (B2, input_dim), dtype=jnp.float32)
    q2 = jax.block_until_ready(deep_q_network_forward(x2, params, block_batch=128))
    q2_ref = reference_forward(x2, params)
    assert q2.shape == (B2, n_actions)
    assert jnp.allclose(q2, q2_ref, atol=2e-2, rtol=2e-2), \
        float(jnp.max(jnp.abs(q2 - q2_ref)))

    # Large-tile path: tb > _ROW_CHUNK exercises the inner row-chunk loop plus
    # boundary masking of the final partial block.
    B3 = 1040
    x3 = jax.random.normal(k_x3, (B3, input_dim), dtype=jnp.float32)
    q3 = jax.block_until_ready(deep_q_network_forward(x3, params))
    q3_ref = reference_forward(x3, params)
    assert q3.shape == (B3, n_actions)
    assert jnp.allclose(q3, q3_ref, atol=2e-2, rtol=2e-2), \
        float(jnp.max(jnp.abs(q3 - q3_ref)))

    # TODO(synk): MSELoss and the Adam optimizer are training-time constructs, not part of forward.
    print("KERNEL_OK")
</pallas_src>

<mosaic_0001>
module attributes {stable_mosaic.version = 11 : i64} {
  func.func @dqn_kernel(%arg0: i32, %arg1: memref<8x16xf32, #tpu.memory_space<vmem>>, %arg2: memref<16x32xbf16, #tpu.memory_space<vmem>>, %arg3: memref<1x32xf32, #tpu.memory_space<vmem>>, %arg4: memref<32x32xbf16, #tpu.memory_space<vmem>>, %arg5: memref<1x32xf32, #tpu.memory_space<vmem>>, %arg6: memref<32x4xbf16, #tpu.memory_space<vmem>>, %arg7: memref<1x4xf32, #tpu.memory_space<vmem>>, %arg8: memref<8x4xf32, #tpu.memory_space<vmem>>) attributes {dimension_semantics = [#tpu.dimension_semantics<parallel>], iteration_bounds = array<i64: 1>, scalar_prefetch = 0 : i64, scratch_operands = 0 : i64, tpu.core_type = #tpu.core_type<tc>, window_params = [{transform_indices = @transform_0, window_bounds = array<i64: 8, 16>}, {pipeline_mode = #tpu.pipeline_mode<synchronous>, transform_indices = @transform_1, window_bounds = array<i64: 16, 32>}, {pipeline_mode = #tpu.pipeline_mode<synchronous>, transform_indices = @transform_2, window_bounds = array<i64: 1, 32>}, {pipeline_mode = #tpu.pipeline_mode<synchronous>, transform_indices = @transform_3, window_bounds = array<i64: 32, 32>}, {pipeline_mode = #tpu.pipeline_mode<synchronous>, transform_indices = @transform_4, window_bounds = array<i64: 1, 32>}, {pipeline_mode = #tpu.pipeline_mode<synchronous>, transform_indices = @transform_5, window_bounds = array<i64: 32, 4>}, {pipeline_mode = #tpu.pipeline_mode<synchronous>, transform_indices = @transform_6, window_bounds = array<i64: 1, 4>}, {transform_indices = @transform_7, window_bounds = array<i64: 8, 4>}]} {
    %c0 = arith.constant 0 : index
    %c0_0 = arith.constant 0 : index
    %0 = vector.load %arg2[%c0, %c0_0] : memref<16x32xbf16, #tpu.memory_space<vmem>>, vector<16x32xbf16>
    %c0_1 = arith.constant 0 : index
    %c0_2 = arith.constant 0 : index
    %1 = vector.load %arg3[%c0_1, %c0_2] : memref<1x32xf32, #tpu.memory_space<vmem>>, vector<1x32xf32>
    %c0_3 = arith.constant 0 : index
    %c0_4 = arith.constant 0 : index
    %2 = vector.load %arg4[%c0_3, %c0_4] : memref<32x32xbf16, #tpu.memory_space<vmem>>, vector<32x32xbf16>
    %c0_5 = arith.constant 0 : index
    %c0_6 = arith.constant 0 : index
    %3 = vector.load %arg5[%c0_5, %c0_6] : memref<1x32xf32, #tpu.memory_space<vmem>>, vector<1x32xf32>
    %c0_7 = arith.constant 0 : index
    %c0_8 = arith.constant 0 : index
    %4 = vector.load %arg6[%c0_7, %c0_8] : memref<32x4xbf16, #tpu.memory_space<vmem>>, vector<32x4xbf16>
    %c0_9 = arith.constant 0 : index
    %c0_10 = arith.constant 0 : index
    %5 = vector.load %arg7[%c0_9, %c0_10] : memref<1x4xf32, #tpu.memory_space<vmem>>, vector<1x4xf32>
    %c0_11 = arith.constant 0 : index
    %c0_12 = arith.constant 0 : index
    %6 = vector.load %arg1[%c0_11, %c0_12] : memref<8x16xf32, #tpu.memory_space<vmem>>, vector<8x16xf32>
    %7 = arith.truncf %6 : vector<8x16xf32> to vector<8x16xbf16>
    %cst = arith.constant dense<0.000000e+00> : vector<8x32xf32>
    %8 = tpu.matmul %7, %0, %cst {dimension_numbers = #tpu.dot_dimension_numbers<[1], [0], [0], [1], [0, 0, 1, 1], [], []>} : vector<8x16xbf16>, vector<16x32xbf16>, vector<8x32xf32> -> vector<8x32xf32>
    %9 = vector.broadcast %1 : vector<1x32xf32> to vector<8x32xf32>
    %10 = arith.addf %8, %9 : vector<8x32xf32>
    %cst_13 = arith.constant 0.000000e+00 : f32
    %11 = vector.broadcast %cst_13 : f32 to vector<8x32xf32>
    %12 = arith.maximumf %10, %11 : vector<8x32xf32>
    %13 = arith.truncf %12 : vector<8x32xf32> to vector<8x32xbf16>
    %cst_14 = arith.constant dense<0.000000e+00> : vector<8x32xf32>
    %14 = tpu.matmul %13, %2, %cst_14 {dimension_numbers = #tpu.dot_dimension_numbers<[1], [0], [0], [1], [0, 0, 1, 1], [], []>} : vector<8x32xbf16>, vector<32x32xbf16>, vector<8x32xf32> -> vector<8x32xf32>
    %15 = vector.broadcast %3 : vector<1x32xf32> to vector<8x32xf32>
    %16 = arith.addf %14, %15 : vector<8x32xf32>
    %cst_15 = arith.constant 0.000000e+00 : f32
    %17 = vector.broadcast %cst_15 : f32 to vector<8x32xf32>
    %18 = arith.maximumf %16, %17 : vector<8x32xf32>
    %19 = arith.truncf %18 : vector<8x32xf32> to vector<8x32xbf16>
    %cst_16 = arith.constant dense<0.000000e+00> : vector<8x4xf32>
    %20 = tpu.matmul %19, %4, %cst_16 {dimension_numbers = #tpu.dot_dimension_numbers<[1], [0], [0], [1], [0, 0, 1, 1], [], []>} : vector<8x32xbf16>, vector<32x4xbf16>, vector<8x4xf32> -> vector<8x4xf32>
    %21 = vector.broadcast %5 : vector<1x4xf32> to vector<8x4xf32>
    %22 = arith.addf %20, %21 : vector<8x4xf32>
    %c0_17 = arith.constant 0 : index
    %c0_18 = arith.constant 0 : index
    %23 = vector.load %arg8[%c0_17, %c0_18] : memref<8x4xf32, #tpu.memory_space<vmem>>, vector<8x4xf32>
    tpu.vector_store %arg8[%c0_17, %c0_18], %22 {strides = array<i32>} : memref<8x4xf32, #tpu.memory_space<vmem>>, vector<8x4xf32>,
    return
  }
  func.func @transform_0(%arg0: i32) -> (i32, i32) {
    %c0_i32 = arith.constant 0 : i32
    %c0_i32_0 = arith.constant 0 : i32
    return %arg0, %c0_i32 : i32, i32
  }
  func.func @transform_1(%arg0: i32) -> (i32, i32) {
    %c0_i32 = arith.constant 0 : i32
    %c0_i32_0 = arith.constant 0 : i32
    %c0_i32_1 = arith.constant 0 : i32
    return %c0_i32, %c0_i32_0 : i32, i32
  }
  func.func @transform_2(%arg0: i32) -> (i32, i32) {
    %c0_i32 = arith.constant 0 : i32
    %c0_i32_0 = arith.constant 0 : i32
    %c0_i32_1 = arith.constant 0 : i32
    return %c0_i32, %c0_i32_0 : i32, i32
  }
  func.func @transform_3(%arg0: i32) -> (i32, i32) {
    %c0_i32 = arith.constant 0 : i32
    %c0_i32_0 = arith.constant 0 : i32
    %c0_i32_1 = arith.constant 0 : i32
    return %c0_i32, %c0_i32_0 : i32, i32
  }
  func.func @transform_4(%arg0: i32) -> (i32, i32) {
    %c0_i32 = arith.constant 0 : i32
    %c0_i32_0 = arith.constant 0 : i32
    %c0_i32_1 = arith.constant 0 : i32
    return %c0_i32, %c0_i32_0 : i32, i32
  }
  func.func @transform_5(%arg0: i32) -> (i32, i32) {
    %c0_i32 = arith.constant 0 : i32
    %c0_i32_0 = arith.constant 0 : i32
    %c0_i32_1 = arith.constant 0 : i32
    return %c0_i32, %c0_i32_0 : i32, i32
  }
  func.func @transform_6(%arg0: i32) -> (i32, i32) {
    %c0_i32 = arith.constant 0 : i32
    %c0_i32_0 = arith.constant 0 : i32
    %c0_i32_1 = arith.constant 0 : i32
    return %c0_i32, %c0_i32_0 : i32, i32
  }
  func.func @transform_7(%arg0: i32) -> (i32, i32) {
    %c0_i32 = arith.constant 0 : i32
    %c0_i32_0 = arith.constant 0 : i32
    return %arg0, %c0_i32 : i32, i32
  }
}

</mosaic_0001>

<bundles_post_ra>
// kernel: tpu_custom_call.1
= control target key start
LH: loop header
LB: loop body
LE: loop exit
PB: predicated region body
PF: predicated region fallthrough
CT: control target
= control target key end

     0   :  { %12 = vsyncpa [#allocation3], 0  ;;  %s334_s0 = inlined_call_operand.hbm [shape: f32[8,16], index: 0, kind: input, shape index: {}]   ;;  %s335_s1 = inlined_call_operand.hbm [shape: bf16[16,32], index: 1, kind: input, shape index: {}]   ;;  %s336_s2 = inlined_call_operand.vmem [shape: f32[1,32], index: 2, kind: input, shape index: {}]   ;;  %s337_s3 = inlined_call_operand.vmem [shape: bf16[32,32], index: 3, kind: input, shape index: {}]   ;;  %s338_s4 = inlined_call_operand.vmem [shape: f32[1,32], index: 4, kind: input, shape index: {}]   ;;  %s339_s5 = inlined_call_operand.vmem [shape: bf16[32,4], index: 5, kind: input, shape index: {}]   ;;  %s340_s6 = inlined_call_operand.vmem [shape: f32[1,4], index: 6, kind: input, shape index: {}]   ;;  %s341_s7 = inlined_call_operand.vmem [shape: f32[8,4], index: 7, kind: output, shape index: {}]  }
   0x1   :  { %s19_s26 = sshll.u32 %s334_s0, 4  ;;  %s20_s26 = int_to_ptr.hbm [resolvable:$true] %s19_s26 }
   0x2   :  { %13 = vsyncpa [#allocation5], 0  ;;  %s260_s27 = smov [#allocation2]   ;;  %s29_s8 = sshll.u32 %s335_s1, 4  ;;  %s30_s8 = int_to_ptr.hbm [resolvable:$true] %s29_s8 }
   0x3   :  { %s21_s28 = sshll.u32 %s260_s27, 4  ;;  %s261_s9 = smov [#allocation4]   ;;  %s22_s28 = int_to_ptr.vmem [resolvable:$true] %s21_s28 }
   0x4   :  { %24 = dma.hbm_to_vmem [thread:$0]  %s20_s26, 128, %s22_s28, [#allocation3]  }
   0x5   :  { %s31_s10 = sshll.u32 %s261_s9, 4  ;;  %s262_s11 = smov 64   ;;  %s32_s10 = int_to_ptr.vmem [resolvable:$true] %s31_s10 }
   0x6   :  { %s263_s12 = smov 4  }
   0x7   :  { %37 = dma.hbm_to_vmem [thread:$0]  %s30_s8, 128, %s32_s10, [#allocation5], %s262_s11, %s262_s11, %s263_s12  }
   0x8   :  { %256 = dma.done.wait [#allocation3], 128  }
   0x9   :  { %257 = vsyncadd [#allocation3], 4294967168 }
   0xa   :  { %258 = dma.done.wait [#allocation5], 128  }
   0xb   :  { %259 = vsyncadd [#allocation5], 4294967168  ;;  %v196_v0 = vld [vmem:[#allocation4] sm:$0xff]  ;;  %v70_v1 = vld [vmem:[#allocation2] sm:$0xff]  ;;  %vm81_vm0 = vcmask 130048   ;;  %vm115_vm1 = vcmask 261120  }
   0xc   :  { %v71_v2 = vpack.c.bf16 %v70_v1, %v70_v1  ;;  %92 = vmatpush.bf16.msra.mxu0 %v196_v0  ;;  %v198_v3 = vld [vmem:[%s337_s3 + $0x8] sm:$0xff]  ;;  %v197_v4 = vld [vmem:[%s337_s3] sm:$0xff]  ;;  %vm165_vm2 = vcmask 31744  }
   0xd   :  { %125 = vmatpush.bf16.msra.mxu1 %v198_v3  ;;  %v205_v5 = vld [vmem:[%s336_s2] ss:$0 sm:$0xff]  ;;  %v200_v11 = vld [vmem:[%s339_s5 + $0x8] sm:$0xff] }
   0xe   :  { %158 = vmatpush.bf16.msra.mxu2 %v200_v11  ;;  %v199_v12 = vld [vmem:[%s339_s5] sm:$0xff] }
   0xf   :  { %177 = vmatmul.msk.bf16.vlgmr.msra.gmra.mxu0 %vm81_vm0, %v71_v2  ;;  %v206_v13 = vld [vmem:[%s338_s4] ss:$0 sm:$0xff] }
  0x10   :  { %v207_v19 = vld [vmem:[%s340_s6] ss:$0 sm:$0xff] }
  0x11   :  { %126 = vmatpush.bf16.msra.mxu1 %v197_v4 }
  0x12   :  { %159 = vmatpush.bf16.msra.mxu2 %v199_v12 }
  0x8c   :  { %v94_v6 = vpop.f32.mrf.mxu0 }
  0x8d   :  { %v95_v7 = vadd.f32 %v205_v5, %v94_v6 }
  0x8f   :  { %v98_v8 = vmax.f32 %v95_v7, 0.0 }
  0x91   :  { %v99_v9 = vpack.c.bf16 %v98_v8, %v98_v8 }
  0x93   :  { %186 = vmatmul.msk.bf16.vlgmr.msra.gmra.mxu1 %vm115_vm1, %v99_v9 }
  0x94   :  { %v96_v10 = vpop.f32.mrf.mxu0 }
 0x110   :  { %v128_v14 = vpop.f32.mrf.mxu1 }
 0x111   :  { %v129_v15 = vadd.f32 %v206_v13, %v128_v14 }
 0x113   :  { %v132_v16 = vmax.f32 %v129_v15, 0.0 }
 0x115   :  { %v133_v17 = vpack.c.bf16 %v132_v16, %v132_v16 }
 0x117   :  { %195 = vmatmul.msk.bf16.vlgmr.msra.gmra.mxu2 %vm115_vm1, %v133_v17 }
 0x118   :  { %v130_v18 = vpop.f32.mrf.mxu1 }
 0x19a   :  { %v161_v20 = vpop.f32.mrf.mxu2 }
 0x19b   :  { %v162_v21 = vadd.f32 %v207_v19, %v161_v20 }
 0x19d   :  { %166 = vst.msk [vmem:[%s341_s7] sm:$0xff] %vm165_vm2, %v162_v21 }
 0x1a2   :  { %v163_v22 = vpop.f32.mrf.mxu2 }
 0x1a3   :  { %171 = vsyncpa [#allocation3], 1 }
 0x1a4   :  { %172 = vsyncpa [#allocation5], 1 }

</bundles_post_ra>
